<compile_context>
chip_gen: v7x
topology: tpu7x:2x2x1
jax: 0.10.0
libtpu: 0.0.40
codegen_flags: <defaults>
</compile_context>

<pallas_src>
import functools

import jax
import jax.numpy as jnp
import numpy as np
from jax.experimental import pallas as pl
from jax.experimental.pallas import tpu as pltpu

EOS = 1e-10
LANES = 128


def _round_up(x, m):
    return -(-x // m) * m


def _edge_tiling(n, block_rows):
    """Lane-dense tiling for a length-n per-edge stream."""
    rows = _round_up(_round_up(n, LANES) // LANES, 8)   # rows of 128, multiple of 8
    br = min(block_rows, rows)                          # block rows (multiple of 8)
    rows_pad = _round_up(rows, br)
    return rows_pad, br


def _to_lane_dense(x, rows_pad, fill):
    total = rows_pad * LANES
    n = x.shape[0]
    if total != n:
        x = jnp.pad(x, (0, total - n), constant_values=fill)
    return x.reshape(rows_pad, LANES)


# ----------------------------------------------------------------------------
# Kernel 1: fused node score
#   h   = relu(x @ W^T + b_emb)                       (never leaves VMEM)
#   s_n = h · ws            with ws = 0.5*(w1 + w2)   -> (TM, 1) per tile
# ----------------------------------------------------------------------------
def node_score_kernel(x_ref, w_ref, b_ref, ws_ref, o_ref):
    h = jnp.dot(x_ref[...], w_ref[...], preferred_element_type=jnp.float32)
    h = jnp.maximum(h + b_ref[...], 0.0)
    o_ref[...] = jnp.sum(h * ws_ref[...], axis=-1, keepdims=True)


def node_scores(features, w_t, b_emb, ws, *, tm=256):
    N, D = features.shape
    H = w_t.shape[1]
    tm = min(tm, _round_up(N, 8))
    n_pad = _round_up(N, tm)
    x = features if n_pad == N else jnp.pad(features, ((0, n_pad - N), (0, 0)))
    out = pl.pallas_call(
        node_score_kernel,
        out_shape=jax.ShapeDtypeStruct((n_pad, 1), jnp.float32),
        grid=(n_pad // tm,),
        in_specs=[
            pl.BlockSpec((tm, D), lambda i: (i, 0)),
            pl.BlockSpec((D, H), lambda i: (0, 0)),
            pl.BlockSpec((1, H), lambda i: (0, 0)),
            pl.BlockSpec((1, H), lambda i: (0, 0)),
        ],
        out_specs=pl.BlockSpec((tm, 1), lambda i: (i, 0)),
        compiler_params=pltpu.CompilerParams(dimension_semantics=("parallel",)),
    )(x, w_t, b_emb.reshape(1, H), ws)
    return out[:N, 0]


# ----------------------------------------------------------------------------
# Kernel 2: gumbel gating, purely elementwise, lane-dense (rows, 128) tiles
#   raw = s[src] + s[dst]            (bias already folded into the scores)
#   eps = (bias - (1-bias))*u + (1-bias)
#   lp  = sigmoid((log(eps) - log(1-eps) + raw) / T),  hp = 1 - lp
# ----------------------------------------------------------------------------
def edge_gumbel_kernel(su_ref, sv_ref, u_ref, lp_ref, hp_ref, *, temperature, bias):
    raw = su_ref[...] + sv_ref[...]
    u = u_ref[...]
    eps = (bias - (1.0 - bias)) * u + (1.0 - bias)
    gate = (jnp.log(eps) - jnp.log(1.0 - eps) + raw) / temperature
    lp = jax.nn.sigmoid(gate)
    lp_ref[...] = lp
    hp_ref[...] = 1.0 - lp


def edge_gumbel(su, sv, u, *, temperature, bias, block_rows=512):
    E = su.shape[0]
    rows_pad, br = _edge_tiling(E, block_rows)
    su2 = _to_lane_dense(su, rows_pad, 0.0)
    sv2 = _to_lane_dense(sv, rows_pad, 0.0)
    u2 = _to_lane_dense(u, rows_pad, 0.5)
    kern = functools.partial(edge_gumbel_kernel, temperature=temperature, bias=bias)
    lp, hp = pl.pallas_call(
        kern,
        out_shape=(jax.ShapeDtypeStruct((rows_pad, LANES), jnp.float32),
                   jax.ShapeDtypeStruct((rows_pad, LANES), jnp.float32)),
        grid=(rows_pad // br,),
        in_specs=[pl.BlockSpec((br, LANES), lambda i: (i, 0))] * 3,
        out_specs=[pl.BlockSpec((br, LANES), lambda i: (i, 0))] * 2,
        compiler_params=pltpu.CompilerParams(dimension_semantics=("parallel",)),
    )(su2, sv2, u2)
    return lp.reshape(-1)[:E], hp.reshape(-1)[:E]


# ----------------------------------------------------------------------------
# Kernel 3: fused EdgeWeightNorm('both') for BOTH branches in one grid sweep
#   lp_e = w_e * out_deg(src)^-1/2 * in_deg(dst)^-1/2
#   hp_e = w_e * out_deg(src)^-1/2 * in_deg(dst)^-1/2 * (-alpha)
#   entries at linear index >= self_start (the appended self loops) -> 1.0
#   (interior tiles skip the iota/select entirely via pl.when)
# ----------------------------------------------------------------------------
def edge_norm_kernel(wlp_ref, dslp_ref, ddlp_ref, whp_ref, dshp_ref, ddhp_ref,
                     olp_ref, ohp_ref, *, alpha, self_start, block_rows):
    row0 = pl.program_id(0) * block_rows
    lp = wlp_ref[...] * jax.lax.rsqrt(dslp_ref[...]) * jax.lax.rsqrt(ddlp_ref[...])
    hp = (whp_ref[...] * jax.lax.rsqrt(dshp_ref[...]) * jax.lax.rsqrt(ddhp_ref[...])
          * (-alpha))
    tile_end = (row0 + block_rows) * LANES

    @pl.when(tile_end <= self_start)
    def _():
        olp_ref[...] = lp
        ohp_ref[...] = hp

    @pl.when(tile_end > self_start)
    def _():
        idx = ((row0 + jax.lax.broadcasted_iota(jnp.int32, lp.shape, 0)) * LANES
               + jax.lax.broadcasted_iota(jnp.int32, lp.shape, 1))
        is_self = idx >= self_start
        olp_ref[...] = jnp.where(is_self, 1.0, lp)
        ohp_ref[...] = jnp.where(is_self, 1.0, hp)


def edge_norm_pair(w_lp, ds_lp, dd_lp, w_hp, ds_hp, dd_hp, *,
                   alpha, n_self, block_rows=512):
    E_all = w_lp.shape[0]
    rows_pad, br = _edge_tiling(E_all, block_rows)
    args = [_to_lane_dense(a, rows_pad, 1.0)
            for a in (w_lp, ds_lp, dd_lp, w_hp, ds_hp, dd_hp)]
    kern = functools.partial(edge_norm_kernel, alpha=alpha,
                             self_start=E_all - n_self, block_rows=br)
    olp, ohp = pl.pallas_call(
        kern,
        out_shape=(jax.ShapeDtypeStruct((rows_pad, LANES), jnp.float32),
                   jax.ShapeDtypeStruct((rows_pad, LANES), jnp.float32)),
        grid=(rows_pad // br,),
        in_specs=[pl.BlockSpec((br, LANES), lambda i: (i, 0))] * 6,
        out_specs=[pl.BlockSpec((br, LANES), lambda i: (i, 0))] * 2,
        compiler_params=pltpu.CompilerParams(dimension_semantics=("parallel",)),
    )(*args)
    return olp.reshape(-1)[:E_all], ohp.reshape(-1)[:E_all]


# ----------------------------------------------------------------------------
# Edge_Discriminator forward
# ----------------------------------------------------------------------------
def edge_discriminator_forward(params, features, edges, u_rand, *,
                               nnodes, alpha, temperature=1.0, bias=1e-4):
    H = params["emb_w_t"].shape[1]
    w_full = params["edge_w"]                      # (1, 2H) from Linear(2H, 1)
    ws = 0.5 * (w_full[:, :H] + w_full[:, H:])     # symmetric-score collapse

    # --- weight_forward ---
    scores = node_scores(features, params["emb_w_t"], params["emb_b"], ws)   # (N,)
    scores = scores + 0.5 * params["edge_b"][0]    # fold edge-MLP bias: s_u+s_v == raw

    src, dst = edges[0], edges[1]
    su = scores[src]                               # scalar gathers (glue, tiny)
    sv = scores[dst]
    weights_lp, weights_hp = edge_gumbel(su, sv, u_rand,
                                         temperature=temperature, bias=bias)

    # --- weight_to_adj ---
    # TODO(synk): DGL graph objects cannot be built on-device; adjacency is
    # returned as (src_all, dst_all, normalized_weights), edge order = original
    # edges followed by per-node self loops (dgl.add_self_loop convention).
    self_idx = jnp.arange(nnodes, dtype=src.dtype)
    src_all = jnp.concatenate([src, self_idx])
    dst_all = jnp.concatenate([dst, self_idx])
    ones = jnp.ones((nnodes,), jnp.float32)

    def degrees(w_edges):
        # TODO(synk): scatter-add weighted degrees stays in XLA glue (no clean
        # Pallas TPU scatter); kernel 3 consumes the gathered per-edge degrees.
        w_all = jnp.concatenate([w_edges, ones]) + EOS
        out_deg = jnp.zeros((nnodes,), jnp.float32).at[src_all].add(w_all)
        in_deg = jnp.zeros((nnodes,), jnp.float32).at[dst_all].add(w_all)
        return w_all, out_deg[src_all], in_deg[dst_all]

    wlp_all, ds_lp, dd_lp = degrees(weights_lp)
    whp_all, ds_hp, dd_hp = degrees(weights_hp)

    adj_lp_w, adj_hp_w = edge_norm_pair(wlp_all, ds_lp, dd_lp,
                                        whp_all, ds_hp, dd_hp,
                                        alpha=alpha, n_self=nnodes)

    return ((src_all, dst_all, adj_lp_w),
            (src_all, dst_all, adj_hp_w),
            weights_lp, weights_hp)


# ----------------------------------------------------------------------------
# Pure-JAX reference (mirrors the PyTorch math) for correctness checking.
# ----------------------------------------------------------------------------
def reference_forward(params, features, edges, u_rand, *,
                      nnodes, alpha, temperature=1.0, bias=1e-4):
    emb = jnp.maximum(features @ params["emb_w_t"] + params["emb_b"][None, :], 0.0)
    src, dst = edges[0], edges[1]
    w = params["edge_w"][0]
    b = params["edge_b"][0]
    s1 = jnp.concatenate([emb[src], emb[dst]], axis=1) @ w + b
    s2 = jnp.concatenate([emb[dst], emb[src]], axis=1) @ w + b
    raw = 0.5 * (s1 + s2)
    eps = (bias - (1.0 - bias)) * u_rand + (1.0 - bias)
    gate = (jnp.log(eps) - jnp.log(1.0 - eps) + raw) / temperature
    weights_lp = jax.nn.sigmoid(gate)
    weights_hp = 1.0 - weights_lp

    self_idx = jnp.arange(nnodes, dtype=src.dtype)
    src_all = jnp.concatenate([src, self_idx])
    dst_all = jnp.concatenate([dst, self_idx])
    ones = jnp.ones((nnodes,), jnp.float32)

    def normalize(w_edges, scale):
        w_all = jnp.concatenate([w_edges, ones]) + EOS
        out_deg = jnp.zeros((nnodes,), jnp.float32).at[src_all].add(w_all)
        in_deg = jnp.zeros((nnodes,), jnp.float32).at[dst_all].add(w_all)
        out = (w_all * jax.lax.rsqrt(out_deg[src_all])
               * jax.lax.rsqrt(in_deg[dst_all]) * scale)
        return out.at[-nnodes:].set(1.0)

    return (normalize(weights_lp, 1.0), normalize(weights_hp, -alpha),
            weights_lp, weights_hp)


if __name__ == "__main__":
    # Small shapes consistent with the module (N, E deliberately not multiples
    # of 128 to exercise the padding paths).
    N = 200        # nnodes
    D = 32         # input_dim
    H = 32         # hidden_dim
    E = 999        # number of edges
    ALPHA = 0.3
    TEMPERATURE = 1.0
    BIAS = 0.0 + 0.0001

    key = jax.random.PRNGKey(0)
    k_feat, k_edge, k_w0, k_b0, k_w1, k_b1, k_u = jax.random.split(key, 7)

    features = jax.random.normal(k_feat, (N, D), jnp.float32)
    edges = jax.random.randint(k_edge, (2, E), 0, N, jnp.int32)
    u_rand = jax.random.uniform(k_u, (E,), jnp.float32)          # torch.rand analogue

    # Deterministic parameter init (shapes from nn.Linear(D,H), nn.Linear(2H,1)).
    params = {
        "emb_w_t": (jax.random.normal(k_w0, (D, H), jnp.float32) * 0.1),  # W^T
        "emb_b": (jax.random.normal(k_b0, (H,), jnp.float32) * 0.1),
        "edge_w": (jax.random.normal(k_w1, (1, 2 * H), jnp.float32) * 0.1),
        "edge_b": (jax.random.normal(k_b1, (1,), jnp.float32) * 0.1),
    }

    (adj_lp, adj_hp, w_lp, w_hp) = edge_discriminator_forward(
        params, features, edges, u_rand,
        nnodes=N, alpha=ALPHA, temperature=TEMPERATURE, bias=BIAS)
    jax.block_until_ready((adj_lp, adj_hp, w_lp, w_hp))

    r_lp_w, r_hp_w, r_w_lp, r_w_hp = reference_forward(
        params, features, edges, u_rand,
        nnodes=N, alpha=ALPHA, temperature=TEMPERATURE, bias=BIAS)

    np.testing.assert_allclose(np.asarray(w_lp), np.asarray(r_w_lp), rtol=1e-5, atol=1e-5)
    np.testing.assert_allclose(np.asarray(w_hp), np.asarray(r_w_hp), rtol=1e-5, atol=1e-5)
    np.testing.assert_allclose(np.asarray(adj_lp[2]), np.asarray(r_lp_w), rtol=1e-5, atol=1e-5)
    np.testing.assert_allclose(np.asarray(adj_hp[2]), np.asarray(r_hp_w), rtol=1e-5, atol=1e-5)

    print("KERNEL_OK")
</pallas_src>

<mosaic_0001>
module attributes {stable_mosaic.version = 11 : i64} {
  func.func @node_score_kernel(%arg0: i32, %arg1: memref<200x32xf32, #tpu.memory_space<vmem>>, %arg2: memref<32x32xf32, #tpu.memory_space<vmem>>, %arg3: memref<1x32xf32, #tpu.memory_space<vmem>>, %arg4: memref<1x32xf32, #tpu.memory_space<vmem>>, %arg5: memref<200x1xf32, #tpu.memory_space<vmem>>) attributes {dimension_semantics = [#tpu.dimension_semantics<parallel>], iteration_bounds = array<i64: 1>, scalar_prefetch = 0 : i64, scratch_operands = 0 : i64, tpu.core_type = #tpu.core_type<tc>, window_params = [{transform_indices = @transform_0, window_bounds = array<i64: 200, 32>}, {pipeline_mode = #tpu.pipeline_mode<synchronous>, transform_indices = @transform_1, window_bounds = array<i64: 32, 32>}, {pipeline_mode = #tpu.pipeline_mode<synchronous>, transform_indices = @transform_2, window_bounds = array<i64: 1, 32>}, {pipeline_mode = #tpu.pipeline_mode<synchronous>, transform_indices = @transform_3, window_bounds = array<i64: 1, 32>}, {transform_indices = @transform_4, window_bounds = array<i64: 200, 1>}]} {
    %c0 = arith.constant 0 : index
    %c0_0 = arith.constant 0 : index
    %0 = vector.load %arg1[%c0, %c0_0] : memref<200x32xf32, #tpu.memory_space<vmem>>, vector<200x32xf32>
    %c0_1 = arith.constant 0 : index
    %c0_2 = arith.constant 0 : index
    %1 = vector.load %arg2[%c0_1, %c0_2] : memref<32x32xf32, #tpu.memory_space<vmem>>, vector<32x32xf32>
    %cst = arith.constant dense<0.000000e+00> : vector<200x32xf32>
    %2 = tpu.matmul %0, %1, %cst {dimension_numbers = #tpu.dot_dimension_numbers<[1], [0], [0], [1], [0, 0, 1, 1], [], []>} : vector<200x32xf32>, vector<32x32xf32>, vector<200x32xf32> -> vector<200x32xf32>
    %c0_3 = arith.constant 0 : index
    %c0_4 = arith.constant 0 : index
    %3 = vector.load %arg3[%c0_3, %c0_4] : memref<1x32xf32, #tpu.memory_space<vmem>>, vector<1x32xf32>
    %4 = vector.broadcast %3 : vector<1x32xf32> to vector<200x32xf32>
    %5 = arith.addf %2, %4 : vector<200x32xf32>
    %cst_5 = arith.constant 0.000000e+00 : f32
    %6 = vector.broadcast %cst_5 : f32 to vector<200x32xf32>
    %7 = arith.maximumf %5, %6 : vector<200x32xf32>
    %c0_6 = arith.constant 0 : index
    %c0_7 = arith.constant 0 : index
    %8 = vector.load %arg4[%c0_6, %c0_7] : memref<1x32xf32, #tpu.memory_space<vmem>>, vector<1x32xf32>
    %9 = vector.broadcast %8 : vector<1x32xf32> to vector<200x32xf32>
    %10 = arith.mulf %7, %9 : vector<200x32xf32>
    %cst_8 = arith.constant dense<0.000000e+00> : vector<200xf32>
    %11 = vector.multi_reduction <add>, %10, %cst_8 [1] : vector<200x32xf32> to vector<200xf32>
    %12 = vector.shape_cast %11 : vector<200xf32> to vector<200x1xf32>
    %c0_9 = arith.constant 0 : index
    %c0_10 = arith.constant 0 : index
    %13 = vector.load %arg5[%c0_9, %c0_10] : memref<200x1xf32, #tpu.memory_space<vmem>>, vector<200x1xf32>
    tpu.vector_store %arg5[%c0_9, %c0_10], %12 {strides = array<i32>} : memref<200x1xf32, #tpu.memory_space<vmem>>, vector<200x1xf32>,
    return
  }
  func.func @transform_0(%arg0: i32) -> (i32, i32) {
    %c0_i32 = arith.constant 0 : i32
    %c0_i32_0 = arith.constant 0 : i32
    return %arg0, %c0_i32 : i32, i32
  }
  func.func @transform_1(%arg0: i32) -> (i32, i32) {
    %c0_i32 = arith.constant 0 : i32
    %c0_i32_0 = arith.constant 0 : i32
    %c0_i32_1 = arith.constant 0 : i32
    return %c0_i32, %c0_i32_0 : i32, i32
  }
  func.func @transform_2(%arg0: i32) -> (i32, i32) {
    %c0_i32 = arith.constant 0 : i32
    %c0_i32_0 = arith.constant 0 : i32
    %c0_i32_1 = arith.constant 0 : i32
    return %c0_i32, %c0_i32_0 : i32, i32
  }
  func.func @transform_3(%arg0: i32) -> (i32, i32) {
    %c0_i32 = arith.constant 0 : i32
    %c0_i32_0 = arith.constant 0 : i32
    %c0_i32_1 = arith.constant 0 : i32
    return %c0_i32, %c0_i32_0 : i32, i32
  }
  func.func @transform_4(%arg0: i32) -> (i32, i32) {
    %c0_i32 = arith.constant 0 : i32
    %c0_i32_0 = arith.constant 0 : i32
    return %arg0, %c0_i32 : i32, i32
  }
}

</mosaic_0001>

<bundles_post_ra>
// kernel: tpu_custom_call.1
= control target key start
LH: loop header
LB: loop body
LE: loop exit
PB: predicated region body
PF: predicated region fallthrough
CT: control target
= control target key end

     0   :  { %v633_v0 = vmov 0.0|0.0   ;;  %vm634_vm0 = vmmov 0   ;;  %v635_v6 = vmov 0.0   ;;  %vm53_vm1 = vcmask 261120   ;;  %s1008_s1 = inlined_call_operand.vmem [shape: f32[32,32], index: 1, kind: input, shape index: {}]   ;;  %s1009_s0 = inlined_call_operand.vmem [shape: f32[200,32], index: 0, kind: input, shape index: {}]   ;;  %s1010_s2 = inlined_call_operand.vmem [shape: f32[1,32], index: 2, kind: input, shape index: {}]   ;;  %s1011_s3 = inlined_call_operand.vmem [shape: f32[1,32], index: 3, kind: input, shape index: {}]   ;;  %s1012_s4 = inlined_call_operand.vmem [shape: f32[200,1], index: 4, kind: output, shape index: {}]  }
   0x1   :  { %620 = vmatprep.subr.bf16.mxu0 %v633_v0  ;;  %626 = vmatprep.subr.bf16.mxu1 %v633_v0  ;;  %v42_v1 = vld [vmem:[%s1008_s1] sm:$0xff]  ;;  %v43_v2 = vld [vmem:[%s1008_s1 + $0x8] sm:$0xff]  ;;  %v44_v3 = vld [vmem:[%s1008_s1 + $0x10] sm:$0xff]  ;;  %vm451_vm2 = vcmask 7168  }
   0x2   :  { %v621_v4 = vpack.c.bf16 %v43_v2, %v42_v1  ;;  %v45_v5 = vld [vmem:[%s1008_s1 + $0x18] sm:$0xff]  ;;  %545 = vmatprep.mubr.msk.f32.mxu0 %vm634_vm0, %v635_v6  ;;  %584 = vmatprep.mubr.msk.f32.mxu1 %vm634_vm0, %v635_v6  ;;  %v17_v8 = vld [vmem:[%s1009_s0] sm:$0xff]  ;;  %v30_v9 = vld [vmem:[%s1009_s0 + $0x68] sm:$0xff] }
   0x3   :  { %v624_v7 = vpack.c.bf16 %v45_v5, %v44_v3  ;;  %v18_v10 = vld [vmem:[%s1009_s0 + $0x8] sm:$0xff]  ;;  %v31_v11 = vld [vmem:[%s1009_s0 + $0x70] sm:$0xff]  ;;  %v32_v13 = vld [vmem:[%s1009_s0 + $0x78] sm:$0xff] }
   0x4   :  { %622 = vmatpush3.bf16.msra.mxu0 %v621_v4  ;;  %628 = vmatpush3.bf16.msra.mxu1 %v621_v4  ;;  %v19_v12 = vld [vmem:[%s1009_s0 + $0x10] sm:$0xff]  ;;  %v20_v14 = vld [vmem:[%s1009_s0 + $0x18] sm:$0xff]  ;;  %v33_v15 = vld [vmem:[%s1009_s0 + $0x80] sm:$0xff] }
   0x5   :  { %623 = vmatprep.subr.bf16.mxu0 %v633_v0  ;;  %627 = vmatprep.subr.bf16.mxu1 %v633_v0  ;;  %v21_v16 = vld [vmem:[%s1009_s0 + $0x20] sm:$0xff]  ;;  %v34_v17 = vld [vmem:[%s1009_s0 + $0x88] sm:$0xff]  ;;  %v35_v19 = vld [vmem:[%s1009_s0 + $0x90] sm:$0xff] }
   0x6   :  { %v22_v18 = vld [vmem:[%s1009_s0 + $0x28] sm:$0xff]  ;;  %v23_v20 = vld [vmem:[%s1009_s0 + $0x30] sm:$0xff]  ;;  %v36_v21 = vld [vmem:[%s1009_s0 + $0x98] sm:$0xff] }
   0x7   :  { %v24_v22 = vld [vmem:[%s1009_s0 + $0x38] sm:$0xff]  ;;  %v37_v23 = vld [vmem:[%s1009_s0 + $0xa0] sm:$0xff]  ;;  %v38_v25 = vld [vmem:[%s1009_s0 + $0xa8] sm:$0xff] }
   0x8   :  { %625 = vmatpush3.bf16.msra.mxu0 %v624_v7  ;;  %629 = vmatpush3.bf16.msra.mxu1 %v624_v7  ;;  %v25_v24 = vld [vmem:[%s1009_s0 + $0x40] sm:$0xff]  ;;  %v26_v26 = vld [vmem:[%s1009_s0 + $0x48] sm:$0xff]  ;;  %v39_v27 = vld [vmem:[%s1009_s0 + $0xb0] sm:$0xff] }
   0x9   :  { %v27_v28 = vld [vmem:[%s1009_s0 + $0x50] sm:$0xff]  ;;  %v40_v29 = vld [vmem:[%s1009_s0 + $0xb8] sm:$0xff]  ;;  %v41_v31 = vld [vmem:[%s1009_s0 + $0xc0] sm:$0xff] }
   0xa   :  { %v28_v30 = vld [vmem:[%s1009_s0 + $0x58] sm:$0xff]  ;;  %v29_v32 = vld [vmem:[%s1009_s0 + $0x60] sm:$0xff] }
   0xb   :  { %546 = vmatmul.mubr.msk.f32.vlgmr.msra.gmra.mrb[0].mxu0 %vm53_vm1, %v17_v8  ;;  %585 = vmatmul.mubr.msk.f32.vlgmr.msra.gmra.mrb[0].mxu1 %vm53_vm1, %v30_v9  ;;  %v826_v33 = vld [vmem:[%s1010_s2] ss:$0 sm:$0xff] }
   0xc   :  { %548 = vmatprep.mubr.msk.f32.mxu0 %vm634_vm0, %v635_v6  ;;  %587 = vmatprep.mubr.msk.f32.mxu1 %vm634_vm0, %v635_v6  ;;  %v833_v40 = vld [vmem:[%s1011_s3] ss:$0 sm:$0xff] }
   0xf   :  { %549 = vmatmul.mubr.msk.f32.gmra.mrb[2].mxu0 %vm53_vm1, %v18_v10  ;;  %588 = vmatmul.mubr.msk.f32.gmra.mrb[2].mxu1 %vm53_vm1, %v31_v11 }
  0x10   :  { %551 = vmatprep.mubr.msk.f32.mxu0 %vm634_vm0, %v635_v6  ;;  %590 = vmatprep.mubr.msk.f32.mxu1 %vm634_vm0, %v635_v6 }
  0x13   :  { %552 = vmatmul.mubr.msk.f32.gmra.mrb[4].mxu0 %vm53_vm1, %v19_v12  ;;  %591 = vmatmul.mubr.msk.f32.gmra.mrb[4].mxu1 %vm53_vm1, %v32_v13 }
  0x14   :  { %554 = vmatprep.mubr.msk.f32.mxu0 %vm634_vm0, %v635_v6  ;;  %593 = vmatprep.mubr.msk.f32.mxu1 %vm634_vm0, %v635_v6 }
  0x17   :  { %555 = vmatmul.mubr.msk.f32.gmra.mrb[6].mxu0 %vm53_vm1, %v20_v14  ;;  %594 = vmatmul.mubr.msk.f32.gmra.mrb[6].mxu1 %vm53_vm1, %v33_v15 }
  0x18   :  { %557 = vmatprep.mubr.msk.f32.mxu0 %vm634_vm0, %v635_v6  ;;  %596 = vmatprep.mubr.msk.f32.mxu1 %vm634_vm0, %v635_v6 }
  0x1b   :  { %558 = vmatmul.mubr.msk.f32.gmra.mrb[8].mxu0 %vm53_vm1, %v21_v16  ;;  %597 = vmatmul.mubr.msk.f32.gmra.mrb[8].mxu1 %vm53_vm1, %v34_v17 }
  0x1c   :  { %560 = vmatprep.mubr.msk.f32.mxu0 %vm634_vm0, %v635_v6  ;;  %599 = vmatprep.mubr.msk.f32.mxu1 %vm634_vm0, %v635_v6 }
  0x1f   :  { %561 = vmatmul.mubr.msk.f32.gmra.mrb[10].mxu0 %vm53_vm1, %v22_v18  ;;  %600 = vmatmul.mubr.msk.f32.gmra.mrb[10].mxu1 %vm53_vm1, %v35_v19 }
  0x20   :  { %563 = vmatprep.mubr.msk.f32.mxu0 %vm634_vm0, %v635_v6  ;;  %602 = vmatprep.mubr.msk.f32.mxu1 %vm634_vm0, %v635_v6 }
  0x23   :  { %564 = vmatmul.mubr.msk.f32.gmra.mrb[12].mxu0 %vm53_vm1, %v23_v20  ;;  %603 = vmatmul.mubr.msk.f32.gmra.mrb[12].mxu1 %vm53_vm1, %v36_v21 }
  0x24   :  { %566 = vmatprep.mubr.msk.f32.mxu0 %vm634_vm0, %v635_v6  ;;  %605 = vmatprep.mubr.msk.f32.mxu1 %vm634_vm0, %v635_v6 }
  0x27   :  { %567 = vmatmul.mubr.msk.f32.gmra.mrb[14].mxu0 %vm53_vm1, %v24_v22  ;;  %606 = vmatmul.mubr.msk.f32.gmra.mrb[14].mxu1 %vm53_vm1, %v37_v23 }
  0x28   :  { %569 = vmatprep.mubr.msk.f32.mxu0 %vm634_vm0, %v635_v6  ;;  %608 = vmatprep.mubr.msk.f32.mxu1 %vm634_vm0, %v635_v6 }
  0x2b   :  { %570 = vmatmul.mubr.msk.f32.gmra.mrb[16].mxu0 %vm53_vm1, %v25_v24  ;;  %609 = vmatmul.mubr.msk.f32.gmra.mrb[16].mxu1 %vm53_vm1, %v38_v25 }
  0x2c   :  { %572 = vmatprep.mubr.msk.f32.mxu0 %vm634_vm0, %v635_v6  ;;  %611 = vmatprep.mubr.msk.f32.mxu1 %vm634_vm0, %v635_v6 }
  0x2f   :  { %573 = vmatmul.mubr.msk.f32.gmra.mrb[18].mxu0 %vm53_vm1, %v26_v26  ;;  %612 = vmatmul.mubr.msk.f32.gmra.mrb[18].mxu1 %vm53_vm1, %v39_v27 }
  0x30   :  { %575 = vmatprep.mubr.msk.f32.mxu0 %vm634_vm0, %v635_v6  ;;  %614 = vmatprep.mubr.msk.f32.mxu1 %vm634_vm0, %v635_v6 }
  0x33   :  { %576 = vmatmul.mubr.msk.f32.gmra.mrb[20].mxu0 %vm53_vm1, %v27_v28  ;;  %615 = vmatmul.mubr.msk.f32.gmra.mrb[20].mxu1 %vm53_vm1, %v40_v29 }
  0x34   :  { %578 = vmatprep.mubr.msk.f32.mxu0 %vm634_vm0, %v635_v6  ;;  %617 = vmatprep.mubr.msk.f32.mxu1 %vm634_vm0, %v635_v6 }
  0x37   :  { %579 = vmatmul.mubr.msk.f32.gmra.mrb[22].mxu0 %vm53_vm1, %v28_v30  ;;  %618 = vmatmul.mubr.msk.f32.gmra.mrb[22].mxu1 %vm53_vm1, %v41_v31 }
  0x38   :  { %581 = vmatprep.mubr.msk.f32.mxu0 %vm634_vm0, %v635_v6 }
  0x3b   :  { %582 = vmatmul.mubr.msk.f32.gmra.mrb[24].mxu0 %vm53_vm1, %v29_v32 }
  0xde   :  { %v195_v34 = vpop.f32.mrb[0].mxu0  ;;  %v260_v35 = vpop.f32.mrb[0].mxu1 }
  0xdf   :  { %v196_v36 = vadd.f32 %v826_v33, %v195_v34  ;;  %v547_v37 = vpop.f32.mrb[1].mxu0  ;;  %v261_v38 = vadd.f32 %v826_v33, %v260_v35  ;;  %v586_v39 = vpop.f32.mrb[1].mxu1 }
  0xe1   :  { %v319_v41 = vmax.f32 %v196_v36, 0.0  ;;  %v332_v42 = vmax.f32 %v261_v38, 0.0 }
  0xe2   :  { %v200_v43 = vpop.f32.mrb[2].mxu0  ;;  %v265_v44 = vpop.f32.mrb[2].mxu1 }
  0xe3   :  { %v201_v45 = vadd.f32 %v826_v33, %v200_v43  ;;  %v550_v46 = vpop.f32.mrb[3].mxu0  ;;  %v266_v47 = vadd.f32 %v826_v33, %v265_v44  ;;  %v589_v48 = vpop.f32.mrb[3].mxu1  ;;  %v351_v49 = vmul.f32 %v833_v40, %v319_v41  ;;  %v364_v50 = vmul.f32 %v833_v40, %v332_v42 }
  0xe5   :  { %v320_v51 = vmax.f32 %v201_v45, 0.0  ;;  %v333_v52 = vmax.f32 %v266_v47, 0.0  ;;  %v376_v53 = vsel %vm53_vm1, %v351_v49, 0.0  ;;  %v415_v54 = vsel %vm53_vm1, %v364_v50, 0.0 }
  0xe6   :  { %377 = vadd.xlane.f32.xlu0 %v376_v53  ;;  %v205_v55 = vpop.f32.mrb[4].mxu0  ;;  %v270_v56 = vpop.f32.mrb[4].mxu1  ;;  %416 = vadd.xlane.f32.xlu1 %v415_v54 }
  0xe7   :  { %v206_v57 = vadd.f32 %v826_v33, %v205_v55  ;;  %v553_v58 = vpop.f32.mrb[5].mxu0  ;;  %v271_v59 = vadd.f32 %v826_v33, %v270_v56  ;;  %v592_v60 = vpop.f32.mrb[5].mxu1  ;;  %v352_v61 = vmul.f32 %v833_v40, %v320_v51  ;;  %v365_v62 = vmul.f32 %v833_v40, %v333_v52 }
  0xe9   :  { %v321_v63 = vmax.f32 %v206_v57, 0.0  ;;  %v334_v0 = vmax.f32 %v271_v59, 0.0  ;;  %v379_v1 = vsel %vm53_vm1, %v352_v61, 0.0  ;;  %v418_v4 = vsel %vm53_vm1, %v365_v62, 0.0 }
  0xea   :  { %v275_v2 = vpop.f32.mrb[6].mxu1  ;;  %380 = vadd.xlane.f32.xlu0 %v379_v1  ;;  %v210_v3 = vpop.f32.mrb[6].mxu0 }
  0xeb   :  { %v276_v5 = vadd.f32 %v826_v33, %v275_v2  ;;  %v211_v6 = vadd.f32 %v826_v33, %v210_v3  ;;  %v556_v7 = vpop.f32.mrb[7].mxu0  ;;  %v595_v8 = vpop.f32.mrb[7].mxu1  ;;  %v353_v9 = vmul.f32 %v833_v40, %v321_v63  ;;  %v366_v10 = vmul.f32 %v833_v40, %v334_v0 }
  0xed   :  { %v335_v11 = vmax.f32 %v276_v5, 0.0  ;;  %v322_v12 = vmax.f32 %v211_v6, 0.0  ;;  %v382_v13 = vsel %vm53_vm1, %v353_v9, 0.0  ;;  %v421_v21 = vsel %vm53_vm1, %v366_v10, 0.0 }
  0xee   :  { %419 = vadd.xlane.f32.xlu0 %v418_v4  ;;  %383 = vadd.xlane.f32.xlu1 %v382_v13  ;;  %v215_v14 = vpop.f32.mrb[8].mxu0  ;;  %v280_v15 = vpop.f32.mrb[8].mxu1 }
  0xef   :  { %v216_v16 = vadd.f32 %v826_v33, %v215_v14  ;;  %v559_v17 = vpop.f32.mrb[9].mxu0  ;;  %v281_v18 = vadd.f32 %v826_v33, %v280_v15  ;;  %v598_v19 = vpop.f32.mrb[9].mxu1  ;;  %v367_v20 = vmul.f32 %v833_v40, %v335_v11  ;;  %v354_v25 = vmul.f32 %v833_v40, %v322_v12 }
  0xf1   :  { %v323_v22 = vmax.f32 %v216_v16, 0.0  ;;  %v336_v23 = vmax.f32 %v281_v18, 0.0  ;;  %v424_v24 = vsel %vm53_vm1, %v367_v20, 0.0  ;;  %v385_v37 = vsel %vm53_vm1, %v354_v25, 0.0 }
  0xf2   :  { %v285_v26 = vpop.f32.mrb[10].mxu1  ;;  %425 = vadd.xlane.f32.xlu0 %v424_v24  ;;  %422 = vadd.xlane.f32.xlu1 %v421_v21  ;;  %v220_v27 = vpop.f32.mrb[10].mxu0 }
  0xf3   :  { %v286_v28 = vadd.f32 %v826_v33, %v285_v26  ;;  %v221_v29 = vadd.f32 %v826_v33, %v220_v27  ;;  %v562_v30 = vpop.f32.mrb[11].mxu0  ;;  %v601_v31 = vpop.f32.mrb[11].mxu1  ;;  %v355_v32 = vmul.f32 %v833_v40, %v323_v22  ;;  %v368_v34 = vmul.f32 %v833_v40, %v336_v23 }
  0xf5   :  { %v337_v35 = vmax.f32 %v286_v28, 0.0  ;;  %v324_v36 = vmax.f32 %v221_v29, 0.0  ;;  %v388_v38 = vsel %vm53_vm1, %v355_v32, 0.0  ;;  %v427_v46 = vsel %vm53_vm1, %v368_v34, 0.0 }
  0xf6   :  { %386 = vadd.xlane.f32.xlu1 %v385_v37  ;;  %389 = vadd.xlane.f32.xlu0 %v388_v38  ;;  %v225_v39 = vpop.f32.mrb[12].mxu0  ;;  %v290_v41 = vpop.f32.mrb[12].mxu1 }
  0xf7   :  { %v226_v42 = vadd.f32 %v826_v33, %v225_v39  ;;  %v565_v43 = vpop.f32.mrb[13].mxu0  ;;  %v291_v44 = vadd.f32 %v826_v33, %v290_v41  ;;  %v604_v45 = vpop.f32.mrb[13].mxu1  ;;  %v369_v47 = vmul.f32 %v833_v40, %v337_v35  ;;  %v356_v51 = vmul.f32 %v833_v40, %v324_v36 }
  0xf9   :  { %v325_v48 = vmax.f32 %v226_v42, 0.0  ;;  %v338_v49 = vmax.f32 %v291_v44, 0.0  ;;  %v430_v50 = vsel %vm53_vm1, %v369_v47, 0.0  ;;  %v391_v62 = vsel %vm53_vm1, %v356_v51, 0.0 }
  0xfa   :  { %v295_v52 = vpop.f32.mrb[14].mxu1  ;;  %428 = vadd.xlane.f32.xlu1 %v427_v46  ;;  %431 = vadd.xlane.f32.xlu0 %v430_v50  ;;  %v230_v53 = vpop.f32.mrb[14].mxu0 }
  0xfb   :  { %v296_v54 = vadd.f32 %v826_v33, %v295_v52  ;;  %v231_v55 = vadd.f32 %v826_v33, %v230_v53  ;;  %v568_v56 = vpop.f32.mrb[15].mxu0  ;;  %v607_v57 = vpop.f32.mrb[15].mxu1  ;;  %v357_v58 = vmul.f32 %v833_v40, %v325_v48  ;;  %v370_v59 = vmul.f32 %v833_v40, %v338_v49 }
  0xfd   :  { %v339_v60 = vmax.f32 %v296_v54, 0.0  ;;  %v326_v61 = vmax.f32 %v231_v55, 0.0  ;;  %v394_v63 = vsel %vm53_vm1, %v357_v58, 0.0  ;;  %v433_v6 = vsel %vm53_vm1, %v370_v59, 0.0 }
  0xfe   :  { %392 = vadd.xlane.f32.xlu1 %v391_v62  ;;  %395 = vadd.xlane.f32.xlu0 %v394_v63  ;;  %v235_v0 = vpop.f32.mrb[16].mxu0  ;;  %v300_v1 = vpop.f32.mrb[16].mxu1 }
  0xff   :  { %v236_v2 = vadd.f32 %v826_v33, %v235_v0  ;;  %v571_v3 = vpop.f32.mrb[17].mxu0  ;;  %v301_v4 = vadd.f32 %v826_v33, %v300_v1  ;;  %v610_v5 = vpop.f32.mrb[17].mxu1  ;;  %v371_v7 = vmul.f32 %v833_v40, %v339_v60  ;;  %v358_v11 = vmul.f32 %v833_v40, %v326_v61 }
 0x101   :  { %v327_v8 = vmax.f32 %v236_v2, 0.0  ;;  %v340_v9 = vmax.f32 %v301_v4, 0.0  ;;  %v436_v10 = vsel %vm53_vm1, %v371_v7, 0.0  ;;  %v397_v22 = vsel %vm53_vm1, %v358_v11, 0.0 }
 0x102   :  { %v305_v12 = vpop.f32.mrb[18].mxu1  ;;  %434 = vadd.xlane.f32.xlu1 %v433_v6  ;;  %437 = vadd.xlane.f32.xlu0 %v436_v10  ;;  %v240_v13 = vpop.f32.mrb[18].mxu0 }
 0x103   :  { %v306_v14 = vadd.f32 %v826_v33, %v305_v12  ;;  %v241_v15 = vadd.f32 %v826_v33, %v240_v13  ;;  %v574_v16 = vpop.f32.mrb[19].mxu0  ;;  %v613_v17 = vpop.f32.mrb[19].mxu1  ;;  %v359_v18 = vmul.f32 %v833_v40, %v327_v8  ;;  %v372_v19 = vmul.f32 %v833_v40, %v340_v9 }
 0x105   :  { %v341_v20 = vmax.f32 %v306_v14, 0.0  ;;  %v328_v21 = vmax.f32 %v241_v15, 0.0  ;;  %v400_v23 = vsel %vm53_vm1, %v359_v18, 0.0  ;;  %v439_v28 = vsel %vm53_vm1, %v372_v19, 0.0 }
 0x106   :  { %398 = vadd.xlane.f32.xlu1 %v397_v22  ;;  %401 = vadd.xlane.f32.xlu0 %v400_v23  ;;  %v245_v24 = vpop.f32.mrb[20].mxu0  ;;  %v310_v25 = vpop.f32.mrb[20].mxu1 }
 0x107   :  { %v246_v26 = vadd.f32 %v826_v33, %v245_v24  ;;  %v577_v27 = vpop.f32.mrb[21].mxu0  ;;  %v373_v29 = vmul.f32 %v833_v40, %v341_v20  ;;  %v311_v30 = vadd.f32 %v826_v33, %v310_v25  ;;  %v616_v31 = vpop.f32.mrb[21].mxu1  ;;  %v360_v35 = vmul.f32 %v833_v40, %v328_v21 }
 0x109   :  { %v329_v32 = vmax.f32 %v246_v26, 0.0  ;;  %v442_v34 = vsel %vm53_vm1, %v373_v29, 0.0  ;;  %v342_v41 = vmax.f32 %v311_v30, 0.0  ;;  %v403_v46 = vsel %vm53_vm1, %v360_v35, 0.0 }
 0x10a   :  { %440 = vadd.xlane.f32.xlu1 %v439_v28  ;;  %443 = vadd.xlane.f32.xlu0 %v442_v34  ;;  %v250_v36 = vpop.f32.mrb[22].mxu0  ;;  %v315_v37 = vpop.f32.mrb[22].mxu1 }
 0x10b   :  { %v251_v38 = vadd.f32 %v826_v33, %v250_v36  ;;  %v580_v39 = vpop.f32.mrb[23].mxu0  ;;  %v361_v42 = vmul.f32 %v833_v40, %v329_v32  ;;  %v316_v43 = vadd.f32 %v826_v33, %v315_v37  ;;  %v619_v44 = vpop.f32.mrb[23].mxu1  ;;  %v374_v53 = vmul.f32 %v833_v40, %v342_v41 }
 0x10d   :  { %v330_v45 = vmax.f32 %v251_v38, 0.0  ;;  %v406_v47 = vsel %vm53_vm1, %v361_v42, 0.0  ;;  %v343_v51 = vmax.f32 %v316_v43, 0.0  ;;  %v445_v56 = vsel %vm53_vm1, %v374_v53, 0.0 }
 0x10e   :  { %404 = vadd.xlane.f32.xlu1 %v403_v46  ;;  %407 = vadd.xlane.f32.xlu0 %v406_v47  ;;  %v255_v48 = vpop.f32.mrb[24].mxu0 }
 0x10f   :  { %v256_v49 = vadd.f32 %v826_v33, %v255_v48  ;;  %v583_v50 = vpop.f32.mrb[25].mxu0  ;;  %v362_v52 = vmul.f32 %v833_v40, %v330_v45  ;;  %v375_v58 = vmul.f32 %v833_v40, %v343_v51 }
 0x111   :  { %v331_v54 = vmax.f32 %v256_v49, 0.0  ;;  %v409_v55 = vsel %vm53_vm1, %v362_v52, 0.0  ;;  %v448_v33 = vsel %vm53_vm1, %v375_v58, 0.0 }
 0x112   :  { %410 = vadd.xlane.f32.xlu1 %v409_v55 }
 0x113   :  { %v363_v57 = vmul.f32 %v833_v40, %v331_v54 }
 0x115   :  { %v412_v59 = vsel %vm53_vm1, %v363_v57, 0.0 }
 0x116   :  { %446 = vadd.xlane.f32.xlu1 %v445_v56  ;;  %413 = vadd.xlane.f32.xlu0 %v412_v59 }
 0x11a   :  { %449 = vadd.xlane.f32.xlu0 %v448_v33 }
 0x173   :  { %v378_v60 = vpop.xlane.xlu0 %377  ;;  %v417_v61 = vpop.xlane.xlu1 %416 }
 0x174   :  { %452 = vst.msk [vmem:[%s1012_s4] sm:$0xff] %vm451_vm2, %v378_v60  ;;  %465 = vst.msk [vmem:[%s1012_s4 + $0x68] sm:$0xff] %vm451_vm2, %v417_v61 }
 0x177   :  { %v381_v40 = vpop.xlane.xlu0 %380 }
 0x178   :  { %453 = vst.msk [vmem:[%s1012_s4 + $0x8] sm:$0xff] %vm451_vm2, %v381_v40 }
 0x17b   :  { %v420_v62 = vpop.xlane.xlu0 %419  ;;  %v384_v63 = vpop.xlane.xlu1 %383 }
 0x17c   :  { %466 = vst.msk [vmem:[%s1012_s4 + $0x70] sm:$0xff] %vm451_vm2, %v420_v62  ;;  %454 = vst.msk [vmem:[%s1012_s4 + $0x10] sm:$0xff] %vm451_vm2, %v384_v63 }
 0x17f   :  { %v426_v0 = vpop.xlane.xlu0 %425  ;;  %v423_v1 = vpop.xlane.xlu1 %422 }
 0x180   :  { %468 = vst.msk [vmem:[%s1012_s4 + $0x80] sm:$0xff] %vm451_vm2, %v426_v0  ;;  %467 = vst.msk [vmem:[%s1012_s4 + $0x78] sm:$0xff] %vm451_vm2, %v423_v1 }
 0x183   :  { %v387_v2 = vpop.xlane.xlu1 %386  ;;  %v390_v3 = vpop.xlane.xlu0 %389 }
 0x184   :  { %455 = vst.msk [vmem:[%s1012_s4 + $0x18] sm:$0xff] %vm451_vm2, %v387_v2  ;;  %456 = vst.msk [vmem:[%s1012_s4 + $0x20] sm:$0xff] %vm451_vm2, %v390_v3 }
 0x187   :  { %v429_v4 = vpop.xlane.xlu1 %428  ;;  %v432_v5 = vpop.xlane.xlu0 %431 }
 0x188   :  { %469 = vst.msk [vmem:[%s1012_s4 + $0x88] sm:$0xff] %vm451_vm2, %v429_v4  ;;  %470 = vst.msk [vmem:[%s1012_s4 + $0x90] sm:$0xff] %vm451_vm2, %v432_v5 }
 0x18b   :  { %v393_v6 = vpop.xlane.xlu1 %392  ;;  %v396_v7 = vpop.xlane.xlu0 %395 }
 0x18c   :  { %457 = vst.msk [vmem:[%s1012_s4 + $0x28] sm:$0xff] %vm451_vm2, %v393_v6  ;;  %458 = vst.msk [vmem:[%s1012_s4 + $0x30] sm:$0xff] %vm451_vm2, %v396_v7 }
 0x18f   :  { %v435_v8 = vpop.xlane.xlu1 %434  ;;  %v438_v9 = vpop.xlane.xlu0 %437 }
 0x190   :  { %471 = vst.msk [vmem:[%s1012_s4 + $0x98] sm:$0xff] %vm451_vm2, %v435_v8  ;;  %472 = vst.msk [vmem:[%s1012_s4 + $0xa0] sm:$0xff] %vm451_vm2, %v438_v9 }
 0x193   :  { %v399_v10 = vpop.xlane.xlu1 %398  ;;  %v402_v11 = vpop.xlane.xlu0 %401 }
 0x194   :  { %459 = vst.msk [vmem:[%s1012_s4 + $0x38] sm:$0xff] %vm451_vm2, %v399_v10  ;;  %460 = vst.msk [vmem:[%s1012_s4 + $0x40] sm:$0xff] %vm451_vm2, %v402_v11 }
 0x197   :  { %v441_v12 = vpop.xlane.xlu1 %440  ;;  %v444_v13 = vpop.xlane.xlu0 %443 }
 0x198   :  { %473 = vst.msk [vmem:[%s1012_s4 + $0xa8] sm:$0xff] %vm451_vm2, %v441_v12  ;;  %474 = vst.msk [vmem:[%s1012_s4 + $0xb0] sm:$0xff] %vm451_vm2, %v444_v13 }
 0x19b   :  { %v405_v14 = vpop.xlane.xlu1 %404  ;;  %v408_v15 = vpop.xlane.xlu0 %407 }
 0x19c   :  { %461 = vst.msk [vmem:[%s1012_s4 + $0x48] sm:$0xff] %vm451_vm2, %v405_v14  ;;  %462 = vst.msk [vmem:[%s1012_s4 + $0x50] sm:$0xff] %vm451_vm2, %v408_v15 }
 0x19f   :  { %v411_v16 = vpop.xlane.xlu1 %410 }
 0x1a0   :  { %463 = vst.msk [vmem:[%s1012_s4 + $0x58] sm:$0xff] %vm451_vm2, %v411_v16 }
 0x1a3   :  { %v447_v17 = vpop.xlane.xlu1 %446  ;;  %v414_v18 = vpop.xlane.xlu0 %413 }
 0x1a4   :  { %475 = vst.msk [vmem:[%s1012_s4 + $0xb8] sm:$0xff] %vm451_vm2, %v447_v17  ;;  %464 = vst.msk [vmem:[%s1012_s4 + $0x60] sm:$0xff] %vm451_vm2, %v414_v18 }
 0x1a7   :  { %v450_v19 = vpop.xlane.xlu0 %449 }
 0x1a8   :  { %476 = vst.msk [vmem:[%s1012_s4 + $0xc0] sm:$0xff] %vm451_vm2, %v450_v19 }

</bundles_post_ra>
